<compile_context>
chip_gen: v5e
topology: v5e:2x2
jax: 0.10.0
libtpu: 0.0.40
codegen_flags: <defaults>
</compile_context>

<pallas_src>
import functools

import jax
import jax.numpy as jnp
from jax import lax
from jax.experimental import pallas as pl
from jax.experimental.pallas import tpu as pltpu


def _inner_product_loss_kernel(src_ns_ref, tgt_ns_ref,   # scalar-prefetch (SMEM)
                               pred_ref, gt_ref,          # VMEM tiles (TB, TN1, N2)
                               out_ref,                    # SMEM output (1,)
                               acc_ref):                   # VMEM scratch (TN1, N2) f32
    bi = pl.program_id(0)   # batch-tile index
    ti = pl.program_id(1)   # row-tile index (reduction axis over N1)

    # Init the vector accumulator once, on the very first grid step.
    @pl.when((bi == 0) & (ti == 0))
    def _():
        acc_ref[...] = jnp.zeros_like(acc_ref)

    TB, TN1, N2 = pred_ref.shape

    # Global row/col indices for this tile (hoisted out of the batch loop).
    row = lax.broadcasted_iota(jnp.int32, (TN1, N2), 0) + ti * TN1
    col = lax.broadcasted_iota(jnp.int32, (TN1, N2), 1)

    b0 = bi * TB
    partial = jnp.zeros((TN1, N2), jnp.float32)
    # TB is small and static (capped in the wrapper), so unrolling is cheap.
    for i in range(TB):
        # Mask rows >= src_ns[b] and cols >= tgt_ns[b]. Padded / out-of-range
        # batch elements have src_ns == 0 -> fully masked, so garbage tile data
        # from partial blocks never contributes.
        mask = (row < src_ns_ref[b0 + i]) & (col < tgt_ns_ref[b0 + i])
        prod = pred_ref[i].astype(jnp.float32) * gt_ref[i].astype(jnp.float32)
        partial = partial + jnp.where(mask, prod, jnp.float32(0.0))
    acc_ref[...] += partial     # VPU-only elementwise accumulate, no per-step reduce

    # Single cross-lane reduction + SMEM store, only in the last grid step.
    @pl.when((bi == pl.num_programs(0) - 1) & (ti == pl.num_programs(1) - 1))
    def _():
        out_ref[0] = jnp.sum(acc_ref[...])


def _choose_tiles(B, N1, N2, itemsize):
    """Pick (TB, TN1): ~1 MiB per input tile, VMEM-safe on v5e/v6e/v7x."""
    target_bytes = 1 << 20
    per_elem = N1 * N2 * itemsize
    if per_elem > target_bytes and N1 > 8:
        # Large instance: one batch element per step, tile rows of N1.
        TB = 1
        rows = max(8, (target_bytes // max(N2 * itemsize, 1)) // 8 * 8)
        TN1 = min(rows, N1)            # multiple of 8, or full N1
    else:
        # Small instance: fold several batch elements into one grid step to
        # amortize per-step overhead. Cap the in-kernel unroll.
        TN1 = N1
        TB = int(min(B, max(1, target_bytes // max(per_elem, 1)), 16))
    return TB, TN1


@functools.partial(jax.jit, static_argnums=())
def inner_product_loss(pred_dsmat, gt_perm, src_ns, tgt_ns):
    """Pallas equivalent of InnerProductLoss.forward. Returns a scalar f32."""
    B, N1, N2 = pred_dsmat.shape
    src_ns = src_ns.astype(jnp.int32)
    tgt_ns = tgt_ns.astype(jnp.int32)

    itemsize = max(jnp.dtype(pred_dsmat.dtype).itemsize,
                   jnp.dtype(gt_perm.dtype).itemsize)
    TB, TN1 = _choose_tiles(B, N1, N2, itemsize)
    nb = pl.cdiv(B, TB)
    nt = pl.cdiv(N1, TN1)

    # Pad the tiny (B,) node-count vectors so partial batch tiles read
    # src_ns == 0 (fully masked) instead of out-of-bounds SMEM.
    Bp = nb * TB
    if Bp != B:
        src_p = jnp.pad(src_ns, (0, Bp - B))
        tgt_p = jnp.pad(tgt_ns, (0, Bp - B))
    else:
        src_p, tgt_p = src_ns, tgt_ns

    bytes_accessed = (pred_dsmat.size * jnp.dtype(pred_dsmat.dtype).itemsize
                      + gt_perm.size * jnp.dtype(gt_perm.dtype).itemsize)

    raw = pl.pallas_call(
        _inner_product_loss_kernel,
        out_shape=jax.ShapeDtypeStruct((1,), jnp.float32),
        grid_spec=pltpu.PrefetchScalarGridSpec(
            num_scalar_prefetch=2,                       # src_ns, tgt_ns -> SMEM
            grid=(nb, nt),                               # (batch tiles, row tiles)
            in_specs=[
                pl.BlockSpec((TB, TN1, N2), lambda bi, ti, s, t: (bi, ti, 0)),
                pl.BlockSpec((TB, TN1, N2), lambda bi, ti, s, t: (bi, ti, 0)),
            ],
            out_specs=pl.BlockSpec(memory_space=pltpu.SMEM),
            scratch_shapes=[
                pltpu.VMEM((TN1, N2), jnp.float32),      # vector accumulator
            ],
        ),
        compiler_params=pltpu.CompilerParams(
            # Single sequential accumulation chain into the scratch accumulator.
            # TODO(synk): v7x two-TC split (parallel batch axis + per-core
            # partial sums merged in the wrapper) for ~2x on v7x.
            dimension_semantics=("arbitrary", "arbitrary")),
        cost_estimate=pl.CostEstimate(
            flops=2 * B * N1 * N2,
            transcendentals=0,
            bytes_accessed=int(bytes_accessed)),
    )(src_p, tgt_p, pred_dsmat, gt_perm)

    # n_sum and the divide are free in the wrapper (src_ns is a tiny vector).
    n_sum = jnp.sum(src_ns).astype(jnp.float32)
    return -raw[0] / n_sum


def _reference_loss(pred, gt, src_ns, tgt_ns):
    """Pure-JAX reference matching the PyTorch loop semantics."""
    B, N1, N2 = pred.shape
    row = jnp.arange(N1)[None, :, None]
    col = jnp.arange(N2)[None, None, :]
    mask = (row < src_ns[:, None, None]) & (col < tgt_ns[:, None, None])
    total = jnp.sum(jnp.where(mask,
                              pred.astype(jnp.float32) * gt.astype(jnp.float32),
                              0.0))
    return -total / jnp.sum(src_ns).astype(jnp.float32)


def _make_inputs(key, B, N1, N2, dtype):
    k1, k2 = jax.random.split(key)
    pred = jax.nn.softmax(
        jax.random.normal(k1, (B, N1, N2), dtype=jnp.float32), axis=-1).astype(dtype)
    perm_idx = jax.random.permutation(
        k2, jnp.tile(jnp.arange(N2)[None, :], (B, 1)), axis=1, independent=True)
    gt = jax.nn.one_hot(perm_idx[:, :N1], N2, dtype=dtype)
    return pred, gt


if __name__ == "__main__":
    key = jax.random.PRNGKey(0)
    ka, kb = jax.random.split(key)

    # Case 1: small f32 instance (matches the original test shapes).
    B, N1, N2 = 2, 8, 8
    pred, gt = _make_inputs(ka, B, N1, N2, jnp.float32)
    src_ns = jnp.array([6, 8], dtype=jnp.int32)
    tgt_ns = jnp.array([7, 5], dtype=jnp.int32)
    # Mirror the PyTorch assertion that gt_perm entries lie in [0, 1].
    assert bool(jnp.all((gt >= 0) & (gt <= 1)))

    loss = inner_product_loss(pred, gt, src_ns, tgt_ns)
    jax.block_until_ready(loss)
    ref = _reference_loss(pred, gt, src_ns, tgt_ns)
    assert jnp.allclose(loss, ref, rtol=1e-5, atol=1e-6), (loss, ref)

    # Case 2: bf16 inputs (no wrapper-side f32 copy), batch-folded tile.
    B2, M1, M2 = 3, 24, 48
    pred2, gt2 = _make_inputs(kb, B2, M1, M2, jnp.bfloat16)
    src_ns2 = jnp.array([20, 24, 11], dtype=jnp.int32)
    tgt_ns2 = jnp.array([40, 17, 48], dtype=jnp.int32)
    assert bool(jnp.all((gt2 >= 0) & (gt2 <= 1)))

    loss2 = inner_product_loss(pred2, gt2, src_ns2, tgt_ns2)
    jax.block_until_ready(loss2)
    ref2 = _reference_loss(pred2, gt2, src_ns2, tgt_ns2)
    assert jnp.allclose(loss2, ref2, rtol=1e-4, atol=1e-5), (loss2, ref2)

    print("KERNEL_OK")
</pallas_src>

<mosaic_0001>
module attributes {stable_mosaic.version = 11 : i64} {
  func.func @_inner_product_loss_kernel(%arg0: i32, %arg1: i32, %arg2: memref<2xi32, #tpu.memory_space<smem>>, %arg3: memref<2xi32, #tpu.memory_space<smem>>, %arg4: memref<2x8x8xf32, #tpu.memory_space<vmem>>, %arg5: memref<2x8x8xf32, #tpu.memory_space<vmem>>, %arg6: memref<1xf32, #tpu.memory_space<smem>>, %arg7: memref<8x8xf32, #tpu.memory_space<vmem>>) attributes {dimension_semantics = [#tpu.dimension_semantics<arbitrary>, #tpu.dimension_semantics<arbitrary>], iteration_bounds = array<i64: 1, 1>, scalar_prefetch = 2 : i64, scratch_operands = 1 : i64, tpu.core_type = #tpu.core_type<tc>, window_params = [{transform_indices = @transform_0, window_bounds = array<i64: 2, 8, 8>}, {transform_indices = @transform_1, window_bounds = array<i64: 2, 8, 8>}, {transform_indices = @transform_2, window_bounds = array<i64: 1>}]} {
    %c0_i32 = arith.constant 0 : i32
    %0 = arith.cmpi eq, %arg0, %c0_i32 : i32
    %c0_i32_0 = arith.constant 0 : i32
    %1 = arith.cmpi eq, %arg1, %c0_i32_0 : i32
    %2 = arith.andi %0, %1 : i1
    %3 = arith.extui %2 : i1 to i32
    %c0_i32_1 = arith.constant 0 : i32
    %4 = arith.cmpi ne, %3, %c0_i32_1 : i32
    scf.if %4 {
      %cst_24 = arith.constant 0.000000e+00 : f32
      %58 = vector.broadcast %cst_24 : f32 to vector<8x8xf32>
      %c0_25 = arith.constant 0 : index
      %c0_26 = arith.constant 0 : index
      %59 = vector.load %arg7[%c0_25, %c0_26] : memref<8x8xf32, #tpu.memory_space<vmem>>, vector<8x8xf32>
      tpu.vector_store %arg7[%c0_25, %c0_26], %58 {strides = array<i32>} : memref<8x8xf32, #tpu.memory_space<vmem>>, vector<8x8xf32>,
    } else {
    }
    %5 = tpu.iota {dimensions = array<i32: 0>} : vector<8x8xi32>
    %c8_i32 = arith.constant 8 : i32
    %6 = arith.muli %arg1, %c8_i32 : i32
    %7 = vector.broadcast %6 : i32 to vector<8x8xi32>
    %8 = arith.addi %5, %7 : vector<8x8xi32>
    %9 = tpu.iota {dimensions = array<i32: 1>} : vector<8x8xi32>
    %c2_i32 = arith.constant 2 : i32
    %10 = arith.muli %arg0, %c2_i32 : i32
    %cst = arith.constant 0.000000e+00 : f32
    %11 = vector.broadcast %cst : f32 to vector<8x8xf32>
    %c0_i32_2 = arith.constant 0 : i32
    %12 = arith.addi %10, %c0_i32_2 : i32
    %13 = arith.index_cast %12 : i32 to index
    %14 = memref.load %arg2[%13] : memref<2xi32, #tpu.memory_space<smem>>
    %15 = vector.broadcast %14 : i32 to vector<8x8xi32>
    %16 = arith.cmpi slt, %8, %15 : vector<8x8xi32>
    %c0_i32_3 = arith.constant 0 : i32
    %17 = arith.addi %10, %c0_i32_3 : i32
    %18 = arith.index_cast %17 : i32 to index
    %19 = memref.load %arg3[%18] : memref<2xi32, #tpu.memory_space<smem>>
    %20 = vector.broadcast %19 : i32 to vector<8x8xi32>
    %21 = arith.cmpi slt, %9, %20 : vector<8x8xi32>
    %22 = arith.andi %16, %21 : vector<8x8xi1>
    %c0 = arith.constant 0 : index
    %c0_4 = arith.constant 0 : index
    %c0_5 = arith.constant 0 : index
    %23 = vector.load %arg4[%c0, %c0_4, %c0_5] : memref<2x8x8xf32, #tpu.memory_space<vmem>>, vector<1x8x8xf32>
    %24 = vector.shape_cast %23 : vector<1x8x8xf32> to vector<8x8xf32>
    %c0_6 = arith.constant 0 : index
    %c0_7 = arith.constant 0 : index
    %c0_8 = arith.constant 0 : index
    %25 = vector.load %arg5[%c0_6, %c0_7, %c0_8] : memref<2x8x8xf32, #tpu.memory_space<vmem>>, vector<1x8x8xf32>
    %26 = vector.shape_cast %25 : vector<1x8x8xf32> to vector<8x8xf32>
    %27 = arith.mulf %24, %26 : vector<8x8xf32>
    %cst_9 = arith.constant 0.000000e+00 : f32
    %28 = vector.broadcast %cst_9 : f32 to vector<8x8xf32>
    %29 = arith.select %22, %27, %28 : vector<8x8xi1>, vector<8x8xf32>
    %30 = arith.addf %11, %29 : vector<8x8xf32>
    %c1_i32 = arith.constant 1 : i32
    %31 = arith.addi %10, %c1_i32 : i32
    %32 = arith.index_cast %31 : i32 to index
    %33 = memref.load %arg2[%32] : memref<2xi32, #tpu.memory_space<smem>>
    %34 = vector.broadcast %33 : i32 to vector<8x8xi32>
    %35 = arith.cmpi slt, %8, %34 : vector<8x8xi32>
    %c1_i32_10 = arith.constant 1 : i32
    %36 = arith.addi %10, %c1_i32_10 : i32
    %37 = arith.index_cast %36 : i32 to index
    %38 = memref.load %arg3[%37] : memref<2xi32, #tpu.memory_space<smem>>
    %39 = vector.broadcast %38 : i32 to vector<8x8xi32>
    %40 = arith.cmpi slt, %9, %39 : vector<8x8xi32>
    %41 = arith.andi %35, %40 : vector<8x8xi1>
    %c1 = arith.constant 1 : index
    %c0_11 = arith.constant 0 : index
    %c0_12 = arith.constant 0 : index
    %42 = vector.load %arg4[%c1, %c0_11, %c0_12] : memref<2x8x8xf32, #tpu.memory_space<vmem>>, vector<1x8x8xf32>
    %43 = vector.shape_cast %42 : vector<1x8x8xf32> to vector<8x8xf32>
    %c1_13 = arith.constant 1 : index
    %c0_14 = arith.constant 0 : index
    %c0_15 = arith.constant 0 : index
    %44 = vector.load %arg5[%c1_13, %c0_14, %c0_15] : memref<2x8x8xf32, #tpu.memory_space<vmem>>, vector<1x8x8xf32>
    %45 = vector.shape_cast %44 : vector<1x8x8xf32> to vector<8x8xf32>
    %46 = arith.mulf %43, %45 : vector<8x8xf32>
    %cst_16 = arith.constant 0.000000e+00 : f32
    %47 = vector.broadcast %cst_16 : f32 to vector<8x8xf32>
    %48 = arith.select %41, %46, %47 : vector<8x8xi1>, vector<8x8xf32>
    %49 = arith.addf %30, %48 : vector<8x8xf32>
    %c0_17 = arith.constant 0 : index
    %c0_18 = arith.constant 0 : index
    %50 = vector.load %arg7[%c0_17, %c0_18] : memref<8x8xf32, #tpu.memory_space<vmem>>, vector<8x8xf32>
    %51 = arith.addf %50, %49 : vector<8x8xf32>
    %c0_19 = arith.constant 0 : index
    %c0_20 = arith.constant 0 : index
    %52 = vector.load %arg7[%c0_19, %c0_20] : memref<8x8xf32, #tpu.memory_space<vmem>>, vector<8x8xf32>
    tpu.vector_store %arg7[%c0_19, %c0_20], %51 {strides = array<i32>} : memref<8x8xf32, #tpu.memory_space<vmem>>, vector<8x8xf32>,
    %c0_i32_21 = arith.constant 0 : i32
    %53 = arith.cmpi eq, %arg0, %c0_i32_21 : i32
    %c0_i32_22 = arith.constant 0 : i32
    %54 = arith.cmpi eq, %arg1, %c0_i32_22 : i32
    %55 = arith.andi %53, %54 : i1
    %56 = arith.extui %55 : i1 to i32
    %c0_i32_23 = arith.constant 0 : i32
    %57 = arith.cmpi ne, %56, %c0_i32_23 : i32
    scf.if %57 {
      %c0_24 = arith.constant 0 : index
      %c0_25 = arith.constant 0 : index
      %58 = vector.load %arg7[%c0_24, %c0_25] : memref<8x8xf32, #tpu.memory_space<vmem>>, vector<8x8xf32>
      %59 = vector.shape_cast %58 : vector<8x8xf32> to vector<1x8x8xf32>
      %cst_26 = arith.constant dense<0.000000e+00> : vector<1xf32>
      %60 = vector.multi_reduction <add>, %59, %cst_26 [1, 2] : vector<1x8x8xf32> to vector<1xf32>
      %61 = vector.shape_cast %60 : vector<1xf32> to vector<1x1x1xf32>
      %62 = vector.extract %61[0, 0, 0] : f32 from vector<1x1x1xf32>
      %c0_27 = arith.constant 0 : index
      %63 = memref.load %arg6[%c0_27] : memref<1xf32, #tpu.memory_space<smem>>
      memref.store %62, %arg6[%c0_27] : memref<1xf32, #tpu.memory_space<smem>>
    } else {
    }
    return
  }
  func.func @transform_0(%arg0: i32, %arg1: i32, %arg2: memref<2xi32, #tpu.memory_space<smem>>, %arg3: memref<2xi32, #tpu.memory_space<smem>>) -> (i32, i32, i32) {
    %c0_i32 = arith.constant 0 : i32
    %c0_i32_0 = arith.constant 0 : i32
    return %arg0, %arg1, %c0_i32 : i32, i32, i32
  }
  func.func @transform_1(%arg0: i32, %arg1: i32, %arg2: memref<2xi32, #tpu.memory_space<smem>>, %arg3: memref<2xi32, #tpu.memory_space<smem>>) -> (i32, i32, i32) {
    %c0_i32 = arith.constant 0 : i32
    %c0_i32_0 = arith.constant 0 : i32
    return %arg0, %arg1, %c0_i32 : i32, i32, i32
  }
  func.func @transform_2(%arg0: i32, %arg1: i32, %arg2: memref<2xi32, #tpu.memory_space<smem>>, %arg3: memref<2xi32, #tpu.memory_space<smem>>) -> i32 {
    %c0_i32 = arith.constant 0 : i32
    %c0_i32_0 = arith.constant 0 : i32
    return %c0_i32 : i32
  }
}

</mosaic_0001>

<bundles_post_ra>
// kernel: inner_product_loss.1
= control target key start
LH: loop header
LB: loop body
LE: loop exit
PB: predicated region body
PF: predicated region fallthrough
CT: control target
= control target key end

     0   :  { %s242_s21 = smov [#allocation4]   ;;  %s243_s22 = smov [#allocation5]   ;;  %s293_s0 = inlined_call_operand.vmem [shape: s32[2], index: 0, kind: input, shape index: {}]   ;;  %s294_s2 = inlined_call_operand.hbm [shape: f32[2,8,8], index: 2, kind: input, shape index: {}]   ;;  %s295_s3 = inlined_call_operand.hbm [shape: f32[2,8,8], index: 3, kind: input, shape index: {}]   ;;  %s296_s4 = inlined_call_operand.hbm [shape: f32[1], index: 4, kind: output, shape index: {}]   ;;  %s297_s1 = inlined_call_operand.vmem [shape: s32[2], index: 1, kind: input, shape index: {}]  }
   0x1   :  { %s10_s17 = sshll.u32 %s293_s0, 4  ;;  %s15_s20 = sshll.u32 %s297_s1, 4  ;;  %s11_s17 = int_to_ptr.vmem [resolvable:$true] %s10_s17  ;;  %s16_s20 = int_to_ptr.vmem [resolvable:$true] %s15_s20 }
   0x2   :  { %13 = dma.vmem_to_smem %s11_s17, 16, %s242_s21, [#allocation3] }
   0x3   :  { %18 = dma.vmem_to_smem %s16_s20, 16, %s243_s22, [#allocation3] }
   0x4   :  { %234 = dma.done.wait [#allocation3], 32 }
   0x5   :  { %235 = vsyncadd [#allocation3], 4294967264 }
   0x6   :  { %21 = sfence }
   0x7   :  { %22 = vsyncpa [#allocation7], 0 }
   0x8   :  { %23 = vsyncpa [#allocation10], 0 }
   0x9   :  { %24 = vsyncpa [#allocation8], 0  ;;  %s29_s0 = sshll.u32 %s294_s2, 4  ;;  %s244_s25 = smov [#allocation6]   ;;  %s30_s0 = int_to_ptr.hbm [resolvable:$true] %s29_s0 }
   0xa   :  { %s31_s26 = sshll.u32 %s244_s25, 4  ;;  %s42_s28 = sshll.u32 %s295_s3, 4  ;;  %s32_s26 = int_to_ptr.vmem [resolvable:$true] %s31_s26  ;;  %s43_s28 = int_to_ptr.hbm [resolvable:$true] %s42_s28 }
   0xb   :  { %s245_s29 = smov 128   ;;  %s246_s30 = smov 8  }
   0xc   :  { %37 = dma.hbm_to_vmem [thread:$0]  %s30_s0, 256, %s32_s26, [#allocation7], %s245_s29, %s245_s29, %s246_s30  }
   0xd   :  { %s247_s5 = smov [#allocation9]  }
   0xe   :  { %s44_s6 = sshll.u32 %s247_s5, 4  ;;  %s45_s6 = int_to_ptr.vmem [resolvable:$true] %s44_s6 }
   0xf   :  { %50 = dma.hbm_to_vmem [thread:$0]  %s43_s28, 256, %s45_s6, [#allocation10], %s245_s29, %s245_s29, %s246_s30  }
  0x10   :  { %236 = dma.done.wait [#allocation7], 256  }
  0x11   :  { %237 = vsyncadd [#allocation7], 4294967040 }
  0x12   :  { %238 = dma.done.wait [#allocation10], 256  }
  0x13   :  { %239 = vsyncadd [#allocation10], 4294967040  ;;  %vm65_vm0 = vcmask 64512   ;;  %v67_v0 = vlaneseq  ;;  %v248_v1 = vmov 0.0   ;;  %s75_s2 = sld [smem:[#allocation4]]  ;;  %v82_v5 = vld [vmem:[#allocation6] sm:$0xff] }
  0x14   :  { %66 = vst.msk [vmem:[#allocation2] sm:$0xff] %vm65_vm0, %v248_v1  ;;  %s78_s7 = sld [smem:[#allocation5]]  ;;  %v83_v6 = vld [vmem:[#allocation9] sm:$0xff]  ;;  %v96_v7 = vld [vmem:[#allocation6 + $0x8] sm:$0xff]  ;;  %v98_v10 = vld [vmem:[#allocation9 + $0x8] sm:$0xff]  ;;  %s126_s11 = sshll.u32 %s296_s4, 4  ;;  %s127_s11 = int_to_ptr.hbm [resolvable:$true] %s126_s11 }
  0x15   :  { %s138_s3 = sld [smem:[#allocation4 + $0x1]]  ;;  %v68_v2 = vshrl.u32 %v67_v0, 7  ;;  %v73_v3 = vand.u32 127, %v67_v0  ;;  %v84_v9 = vmul.f32 %v83_v6, %v82_v5  ;;  %v99_v12 = vmul.f32 %v98_v10, %v96_v7  ;;  %s249_s13 = smov [#allocation11]  }
  0x16   :  { %s139_s8 = sld [smem:[#allocation5 + $0x1]] }
  0x19   :  { %v76_v4 = vstv %s75_s2 }
  0x1a   :  { %vm77_vm1 = vcmp.lt.s32.totalorder %v68_v2, %v76_v4  ;;  %v79_v8 = vstv %s78_s7 }
  0x1b   :  { %vm80_vm2 = vcmp.lt.s32.totalorder %v73_v3, %v79_v8  ;;  %v89_v11 = vstv %s138_s3  ;;  %v102_v16 = vld [vmem:[#allocation2] sm:$0xff] }
  0x1c   :  { %vm81_vm3 = vmand %vm77_vm1, %vm80_vm2  ;;  %vm90_vm4 = vcmp.lt.s32.totalorder %v68_v2, %v89_v11  ;;  %v92_v13 = vstv %s139_s8 }
  0x1d   :  { %v85_v14 = vsel %vm81_vm3, %v84_v9, 0.0  ;;  %vm93_vm5 = vcmp.lt.s32.totalorder %v73_v3, %v92_v13 }
  0x1e   :  { %vm94_vm6 = vmand %vm90_vm4, %vm93_vm5 }
  0x1f   :  { %v100_v15 = vsel %vm94_vm6, %v99_v12, 0.0 }
  0x20   :  { %v101_v17 = vadd.f32 %v100_v15, %v85_v14 }
  0x22   :  { %v103_v18 = vadd.f32 %v102_v16, %v101_v17 }
  0x24   :  { %105 = vst.msk [vmem:[#allocation2] sm:$0xff] %vm65_vm0, %v103_v18 }
  0x2b   :  { %v108_v19 = vld [vmem:[#allocation2] sm:$0xff] }
  0x2c   :  { %v109_v20 = vsel %vm65_vm0, %v108_v19, 0.0 }
  0x2d   :  { %110 = vadd.xlane.f32.xlu0 %v109_v20 }
  0xa0   :  { %v111_v21 = vpop.xlane.xlu0 %110 }
  0xa1   :  { %v112_v22 = vrot.slane %v111_v21, 4 }
  0xa3   :  { %v113_v23 = vadd.f32 %v112_v22, %v111_v21 }
  0xa5   :  { %v114_v24 = vrot.slane %v113_v23, 2 }
  0xa7   :  { %v115_v25 = vadd.f32 %v114_v24, %v113_v23 }
  0xa9   :  { %v116_v26 = vrot.slane %v115_v25, 1 }
  0xab   :  { %v117_v27 = vadd.f32 %v116_v26, %v115_v25 }
  0xad   :  { %140 = vpush %v117_v27 }
  0xde   :  { %s141_s12 = spop %140 }
  0xdf   :  { %120 = sst [smem:[#allocation11]] %s141_s12 }
  0xe0   :  { %129 = dma.smem_to_hbm %s249_s13, 16, %s127_s11, [#allocation8]  }
  0xe1   :  { %240 = dma.done.wait [#allocation8], 16  }
  0xe2   :  { %241 = vsyncadd [#allocation8], 4294967280 }
  0xe3   :  { %134 = sfence }
  0xe4   :  { %135 = vsyncpa [#allocation7], 1 }
  0xe5   :  { %136 = vsyncpa [#allocation10], 1 }
  0xe6   :  { %137 = vsyncpa [#allocation8], 1 }

</bundles_post_ra>
